<compile_context>
chip_gen: v7x
topology: tpu7x:2x2x1
jax: 0.10.0
libtpu: 0.0.40
codegen_flags: <defaults>
</compile_context>

<pallas_src>
import jax
import jax.numpy as jnp
from jax.experimental import pallas as pl
from jax.experimental.pallas import tpu as pltpu


_LANE = 128
_SUBLANE = 16  # multiple of 16 keeps bf16 packed-sublane layout clean (8 suffices for f32)


def _round_up(v, m):
    return ((v + m - 1) // m) * m


def _linear_kernel(x_ref, w_ref, b_ref, o_ref):
    # x_ref: (TM, H), w_ref: (H, C_pad), b_ref: (1, C_pad), o_ref: (TM, C_pad)
    acc = jnp.dot(x_ref[...], w_ref[...], preferred_element_type=jnp.float32)
    o_ref[...] = (acc + b_ref[...].astype(jnp.float32)).astype(o_ref.dtype)


def prepare_to_logits_params(weight, bias):
    """One-time (module-init) param prep: transpose W and pad the class dim to 128.

    weight: [n_classes, hidden] (PyTorch nn.Linear layout)
    bias:   [n_classes]
    returns (weight_t_pad [H, C_pad], bias_pad [1, C_pad], n_classes)
    """
    n_classes, _hidden = weight.shape
    c_pad = _round_up(n_classes, _LANE)
    weight_t = weight.T  # [H, C]
    if c_pad != n_classes:
        weight_t = jnp.pad(weight_t, ((0, 0), (0, c_pad - n_classes)))
        bias = jnp.pad(bias, (0, c_pad - n_classes))
    return weight_t, bias.reshape(1, c_pad), n_classes


def _vmem_capacity_bytes():
    try:
        return int(pltpu.get_tpu_info().vmem_capacity_bytes)
    except Exception:
        return 64 * 1024 * 1024  # conservative: v7x per-TC VMEM


def to_logits_pallas(x, weight_t_pad, bias_pad, *, n_classes=None, tm=1024):
    """y = x @ W.T + b  with pre-padded params (see prepare_to_logits_params).

    x:            [T, H]          (f32 or bf16; bf16 halves HBM traffic, f32 accumulation)
    weight_t_pad: [H, C_pad]
    bias_pad:     [1, C_pad]
    returns       [T, n_classes]  (or [T, C_pad] if n_classes is None)
    """
    T, H = x.shape
    H2, C_pad = weight_t_pad.shape
    assert H == H2 and bias_pad.shape == (1, C_pad)
    out_dtype = x.dtype

    x_size = jnp.dtype(x.dtype).itemsize
    w_size = jnp.dtype(weight_t_pad.dtype).itemsize
    o_size = jnp.dtype(out_dtype).itemsize

    # --- Per-generation VMEM budget: shrink TM (not the limit) if we don't fit. ---
    vmem_cap = _vmem_capacity_bytes()
    budget = int(0.75 * vmem_cap)
    resident = (H * C_pad + C_pad) * w_size  # single-buffered weight + bias

    if T <= tm:
        # Single grid step; block == full token dim (no (8,128) divisibility needed).
        TM = T
    else:
        TM = _round_up(min(tm, T), _SUBLANE)
        while TM > _SUBLANE and resident + 2 * TM * (H * x_size + C_pad * o_size) > budget:
            TM = max(_SUBLANE, _round_up(TM // 2, _SUBLANE))
    # TODO(synk): if resident weight alone ever exceeds the budget (very large H*C),
    # add a K grid axis with an f32 VMEM accumulator instead of full weight residency.

    demand = resident + 2 * TM * (H * x_size + C_pad * o_size)
    vmem_limit = int(min(max(demand + (4 << 20), 32 * 1024 * 1024), vmem_cap))

    grid = (pl.cdiv(T, TM),)  # ragged last tile handled by Pallas (no pad/slice round trip)

    flops = 2 * T * H * C_pad
    bytes_accessed = (
        T * H * x_size            # read x
        + H * C_pad * w_size      # read weight (resident, counted once)
        + C_pad * w_size          # read bias
        + T * C_pad * o_size      # write logits
    )

    def _call(single_buffer_params):
        if single_buffer_params:
            w_spec = pl.BlockSpec((H, C_pad), lambda i: (0, 0),
                                  pipeline_mode=pl.Buffered(1))
            b_spec = pl.BlockSpec((1, C_pad), lambda i: (0, 0),
                                  pipeline_mode=pl.Buffered(1))
        else:
            w_spec = pl.BlockSpec((H, C_pad), lambda i: (0, 0))
            b_spec = pl.BlockSpec((1, C_pad), lambda i: (0, 0))
        return pl.pallas_call(
            _linear_kernel,
            out_shape=jax.ShapeDtypeStruct((T, C_pad), out_dtype),
            grid=grid,
            in_specs=[
                pl.BlockSpec((TM, H), lambda i: (i, 0)),   # x tile, streamed/double-buffered
                w_spec,                                    # weight, resident
                b_spec,                                    # bias, resident
            ],
            out_specs=pl.BlockSpec((TM, C_pad), lambda i: (i, 0)),
            compiler_params=pltpu.CompilerParams(
                dimension_semantics=("parallel",),         # independent tiles -> 2 TCs on v7x
                vmem_limit_bytes=vmem_limit,
            ),
            cost_estimate=pl.CostEstimate(
                flops=flops, transcendentals=0, bytes_accessed=bytes_accessed
            ),
        )(x, weight_t_pad, bias_pad)

    try:
        out = _call(True)   # single-buffered grid-invariant params (halves their residency)
    except Exception:
        out = _call(False)  # fall back to default double-buffering if Buffered(1) is rejected

    if n_classes is not None and n_classes != C_pad:
        out = out[:, :n_classes]  # tiny slice at the consumer; keep [T, C_pad] if preferred
    return out


def segmentor_forward(x, weight_t_pad=None, bias_pad=None, extra_args=None, **kwargs):
    """Faithful reproduction of Segmentor.forward: it returns None."""
    # The PyTorch reference never calls self.to_logits in forward(); logits stays None.
    logits = None
    return logits


if __name__ == "__main__":
    # Small shapes consistent with the module: batch=2, seq=8, hidden=32, n_classes=8.
    # TODO(synk): at these toy sizes a plain XLA fusion (x @ W.T + b) beats any
    # pallas_call; the kernel pays off once T reaches thousands of tokens.
    batch, seq, hidden, n_classes = 2, 8, 32, 8

    key = jax.random.PRNGKey(0)
    k_x, k_w, k_b = jax.random.split(key, 3)

    x = jax.random.normal(k_x, (batch, seq, hidden), dtype=jnp.float32)
    # Deterministic synthetic parameters for nn.Linear(hidden, n_classes):
    weight = jax.random.normal(k_w, (n_classes, hidden), dtype=jnp.float32) * 0.02
    bias = jax.random.normal(k_b, (n_classes,), dtype=jnp.float32) * 0.02

    # One-time param prep (module-init style): transpose + pad class dim to 128 lanes.
    weight_t_pad, bias_pad, n_cls = prepare_to_logits_params(weight, bias)

    # Run the Pallas kernel implementing self.to_logits on the flattened tokens.
    x_flat = x.reshape(batch * seq, hidden)
    logits_kernel = to_logits_pallas(x_flat, weight_t_pad, bias_pad, n_classes=n_cls)
    logits_kernel = jax.block_until_ready(logits_kernel)

    # Check against a pure-JAX reference of the Linear layer.
    ref = x_flat @ weight.T + bias
    assert logits_kernel.shape == (batch * seq, n_classes)
    assert jnp.allclose(logits_kernel, ref, atol=1e-5, rtol=1e-5)

    # Faithful forward() semantics: returns None, exactly like the PyTorch module.
    out = segmentor_forward(x, weight_t_pad, bias_pad)
    assert out is None

    print("KERNEL_OK")
</pallas_src>

<mosaic_0001>
module attributes {stable_mosaic.version = 11 : i64} {
  func.func @_linear_kernel(%arg0: i32, %arg1: memref<16x32xf32, #tpu.memory_space<vmem>>, %arg2: memref<32x128xf32, #tpu.memory_space<vmem>>, %arg3: memref<1x128xf32, #tpu.memory_space<vmem>>, %arg4: memref<16x128xf32, #tpu.memory_space<vmem>>) attributes {dimension_semantics = [#tpu.dimension_semantics<parallel>], iteration_bounds = array<i64: 1>, scalar_prefetch = 0 : i64, scratch_operands = 0 : i64, tpu.core_type = #tpu.core_type<tc>, window_params = [{transform_indices = @transform_0, window_bounds = array<i64: 16, 32>}, {pipeline_mode = #tpu.pipeline_mode<synchronous>, transform_indices = @transform_1, window_bounds = array<i64: 32, 128>}, {pipeline_mode = #tpu.pipeline_mode<synchronous>, transform_indices = @transform_2, window_bounds = array<i64: 1, 128>}, {transform_indices = @transform_3, window_bounds = array<i64: 16, 128>}]} {
    %c0 = arith.constant 0 : index
    %c0_0 = arith.constant 0 : index
    %0 = vector.load %arg1[%c0, %c0_0] : memref<16x32xf32, #tpu.memory_space<vmem>>, vector<16x32xf32>
    %c0_1 = arith.constant 0 : index
    %c0_2 = arith.constant 0 : index
    %1 = vector.load %arg2[%c0_1, %c0_2] : memref<32x128xf32, #tpu.memory_space<vmem>>, vector<32x128xf32>
    %cst = arith.constant dense<0.000000e+00> : vector<16x128xf32>
    %2 = tpu.matmul %0, %1, %cst {dimension_numbers = #tpu.dot_dimension_numbers<[1], [0], [0], [1], [0, 0, 1, 1], [], []>} : vector<16x32xf32>, vector<32x128xf32>, vector<16x128xf32> -> vector<16x128xf32>
    %c0_3 = arith.constant 0 : index
    %c0_4 = arith.constant 0 : index
    %3 = vector.load %arg3[%c0_3, %c0_4] : memref<1x128xf32, #tpu.memory_space<vmem>>, vector<1x128xf32>
    %4 = vector.broadcast %3 : vector<1x128xf32> to vector<16x128xf32>
    %5 = arith.addf %2, %4 : vector<16x128xf32>
    %c0_5 = arith.constant 0 : index
    %c0_6 = arith.constant 0 : index
    %6 = vector.load %arg4[%c0_5, %c0_6] : memref<16x128xf32, #tpu.memory_space<vmem>>, vector<16x128xf32>
    tpu.vector_store %arg4[%c0_5, %c0_6], %5 {strides = array<i32>} : memref<16x128xf32, #tpu.memory_space<vmem>>, vector<16x128xf32>,
    return
  }
  func.func @transform_0(%arg0: i32) -> (i32, i32) {
    %c0_i32 = arith.constant 0 : i32
    %c0_i32_0 = arith.constant 0 : i32
    return %arg0, %c0_i32 : i32, i32
  }
  func.func @transform_1(%arg0: i32) -> (i32, i32) {
    %c0_i32 = arith.constant 0 : i32
    %c0_i32_0 = arith.constant 0 : i32
    %c0_i32_1 = arith.constant 0 : i32
    return %c0_i32, %c0_i32_0 : i32, i32
  }
  func.func @transform_2(%arg0: i32) -> (i32, i32) {
    %c0_i32 = arith.constant 0 : i32
    %c0_i32_0 = arith.constant 0 : i32
    %c0_i32_1 = arith.constant 0 : i32
    return %c0_i32, %c0_i32_0 : i32, i32
  }
  func.func @transform_3(%arg0: i32) -> (i32, i32) {
    %c0_i32 = arith.constant 0 : i32
    %c0_i32_0 = arith.constant 0 : i32
    return %arg0, %c0_i32 : i32, i32
  }
}

module attributes {stable_mosaic.version = 11 : i64} {
  func.func @_linear_kernel(%arg0: i32, %arg1: memref<16x32xf32, #tpu.memory_space<vmem>>, %arg2: memref<32x128xf32, #tpu.memory_space<vmem>>, %arg3: memref<1x128xf32, #tpu.memory_space<vmem>>, %arg4: memref<16x128xf32, #tpu.memory_space<vmem>>) attributes {dimension_semantics = [#tpu.dimension_semantics<parallel>], iteration_bounds = array<i64: 1>, scalar_prefetch = 0 : i64, scratch_operands = 0 : i64, tpu.core_type = #tpu.core_type<tc>, window_params = [{transform_indices = @transform_0, window_bounds = array<i64: 16, 32>}, {pipeline_mode = #tpu.pipeline_mode<synchronous>, transform_indices = @transform_1, window_bounds = array<i64: 32, 128>}, {pipeline_mode = #tpu.pipeline_mode<synchronous>, transform_indices = @transform_2, window_bounds = array<i64: 1, 128>}, {transform_indices = @transform_3, window_bounds = array<i64: 16, 128>}]} {
    %c0 = arith.constant 0 : index
    %c0_0 = arith.constant 0 : index
    %0 = vector.load %arg1[%c0, %c0_0] : memref<16x32xf32, #tpu.memory_space<vmem>>, vector<16x32xf32>
    %c0_1 = arith.constant 0 : index
    %c0_2 = arith.constant 0 : index
    %1 = vector.load %arg2[%c0_1, %c0_2] : memref<32x128xf32, #tpu.memory_space<vmem>>, vector<32x128xf32>
    %cst = arith.constant dense<0.000000e+00> : vector<16x128xf32>
    %2 = tpu.matmul %0, %1, %cst {dimension_numbers = #tpu.dot_dimension_numbers<[1], [0], [0], [1], [0, 0, 1, 1], [], []>} : vector<16x32xf32>, vector<32x128xf32>, vector<16x128xf32> -> vector<16x128xf32>
    %c0_3 = arith.constant 0 : index
    %c0_4 = arith.constant 0 : index
    %3 = vector.load %arg3[%c0_3, %c0_4] : memref<1x128xf32, #tpu.memory_space<vmem>>, vector<1x128xf32>
    %4 = vector.broadcast %3 : vector<1x128xf32> to vector<16x128xf32>
    %5 = arith.addf %2, %4 : vector<16x128xf32>
    %c0_5 = arith.constant 0 : index
    %c0_6 = arith.constant 0 : index
    %6 = vector.load %arg4[%c0_5, %c0_6] : memref<16x128xf32, #tpu.memory_space<vmem>>, vector<16x128xf32>
    tpu.vector_store %arg4[%c0_5, %c0_6], %5 {strides = array<i32>} : memref<16x128xf32, #tpu.memory_space<vmem>>, vector<16x128xf32>,
    return
  }
  func.func @transform_0(%arg0: i32) -> (i32, i32) {
    %c0_i32 = arith.constant 0 : i32
    %c0_i32_0 = arith.constant 0 : i32
    return %arg0, %c0_i32 : i32, i32
  }
  func.func @transform_1(%arg0: i32) -> (i32, i32) {
    %c0_i32 = arith.constant 0 : i32
    %c0_i32_0 = arith.constant 0 : i32
    %c0_i32_1 = arith.constant 0 : i32
    return %c0_i32, %c0_i32_0 : i32, i32
  }
  func.func @transform_2(%arg0: i32) -> (i32, i32) {
    %c0_i32 = arith.constant 0 : i32
    %c0_i32_0 = arith.constant 0 : i32
    %c0_i32_1 = arith.constant 0 : i32
    return %c0_i32, %c0_i32_0 : i32, i32
  }
  func.func @transform_3(%arg0: i32) -> (i32, i32) {
    %c0_i32 = arith.constant 0 : i32
    %c0_i32_0 = arith.constant 0 : i32
    return %arg0, %c0_i32 : i32, i32
  }
}

</mosaic_0001>

<bundles_post_ra>
// kernel: tpu_custom_call.1
= control target key start
LH: loop header
LB: loop body
LE: loop exit
PB: predicated region body
PF: predicated region fallthrough
CT: control target
= control target key end

     0   :  { %8 = vsyncpa [#allocation3], 0  ;;  %s336_s0 = inlined_call_operand.hbm [shape: f32[16,32], index: 0, kind: input, shape index: {}]   ;;  %s337_s1 = inlined_call_operand.hbm [shape: f32[32,128], index: 1, kind: input, shape index: {}]   ;;  %s338_s2 = inlined_call_operand.vmem [shape: f32[1,128], index: 2, kind: input, shape index: {}]   ;;  %s339_s3 = inlined_call_operand.hbm [shape: f32[16,128], index: 3, kind: output, shape index: {}]  }
   0x1   :  { %9 = vsyncpa [#allocation6], 0 }
   0x2   :  { %10 = vsyncpa [#allocation4], 0  ;;  %s263_s12 = smov [#allocation2]   ;;  %s191_s16 = scalar_lea.hbm %s336_s0, 256 }
   0x3   :  { %s16_s13 = sshll.u32 %s263_s12, 4  ;;  %p192_p0 = scmp.ne.s32.totalorder %s336_s0, %s191_s16  ;;  %s17_s13 = int_to_ptr.vmem [resolvable:$true] %s16_s13 }
   0x4   :  { %p195_p1 = scmp.lt.u32.totalorder %s191_s16, %s336_s0 }
   0x6   :  { %p197_p2 = pnand %p195_p1, %p192_p0 }
   0x8   :  { %200 = shalt.err (!%p197_p2)
}
   0x9   :  { %s201_s21 = scalar_lea.vmem %s17_s13, 256  ;;  %p206_p4 = scmp.lt.s32.totalorder %s17_s13, %s17_s13 }
   0xa   :  { %p202_p3 = scmp.ne.s32.totalorder %s17_s13, %s201_s21  ;;  %p207_p5 = scmp.lt.s32.totalorder %s201_s21, %s201_s21 }
   0xc   :  { %p208_p6 = por %p207_p5, %p206_p4 }
   0xe   :  { %p209_p7 = pnand %p208_p6, %p202_p3 }
  0x10   :  { %212 = shalt.err (!%p209_p7)
}
  0x11   :  { %s264_s22 = smov 128   ;;  %s265_s23 = smov 8  }
  0x12   :  { %22 = dma.hbm_to_vmem [thread:$0]  %s336_s0, 256, %s17_s13, [#allocation3], %s264_s22, %s264_s22, %s265_s23  }
  0x13   :  { %s266_s26 = smov [#allocation5]   ;;  %s213_s30 = scalar_lea.hbm %s337_s1, 512 }
  0x14   :  { %s28_s27 = sshll.u32 %s266_s26, 4  ;;  %p214_p8 = scmp.ne.s32.totalorder %s337_s1, %s213_s30  ;;  %s29_s27 = int_to_ptr.vmem [resolvable:$true] %s28_s27 }
  0x15   :  { %p217_p9 = scmp.lt.u32.totalorder %s213_s30, %s337_s1 }
  0x17   :  { %p219_p10 = pnand %p217_p9, %p214_p8 }
  0x19   :  { %222 = shalt.err (!%p219_p10)
}
  0x1a   :  { %s223_s8 = scalar_lea.vmem %s29_s27, 512  ;;  %p228_p12 = scmp.lt.s32.totalorder %s29_s27, %s29_s27 }
  0x1b   :  { %p224_p11 = scmp.ne.s32.totalorder %s29_s27, %s223_s8  ;;  %p229_p13 = scmp.lt.s32.totalorder %s223_s8, %s223_s8 }
  0x1d   :  { %p230_p0 = por %p229_p13, %p228_p12 }
  0x1f   :  { %p231_p1 = pnand %p230_p0, %p224_p11 }
  0x21   :  { %234 = shalt.err (!%p231_p1)
}
  0x22   :  { %34 = dma.hbm_to_vmem [thread:$0]  %s337_s1, 512, %s29_s27, [#allocation6], %s264_s22, %s264_s22, %s265_s23  }
  0x23   :  { %257 = dma.done.wait [#allocation3], 256  }
  0x24   :  { %258 = vsyncadd [#allocation3], 4294967040 }
  0x25   :  { %259 = dma.done.wait [#allocation6], 512  }
  0x26   :  { %260 = vsyncadd [#allocation6], 4294966784  ;;  %vm56_vm0 = vcmask 261120   ;;  %v45_v0 = vld [vmem:[#allocation5] sm:$0xff]  ;;  %v46_v1 = vld [vmem:[#allocation5 + $0x8] sm:$0xff]  ;;  %s267_s11 = smov [#allocation7]  }
  0x27   :  { %v47_v2 = vld [vmem:[#allocation5 + $0x10] sm:$0xff]  ;;  %v178_v3 = vpack.c.bf16 %v46_v1, %v45_v0  ;;  %v48_v4 = vld [vmem:[#allocation5 + $0x18] sm:$0xff]  ;;  %s145_s12 = sshll.u32 %s267_s11, 4  ;;  %s146_s12 = int_to_ptr.vmem [resolvable:$true] %s145_s12 }
  0x28   :  { %v43_v5 = vld [vmem:[#allocation2] sm:$0xff]  ;;  %v182_v6 = vpack.c.bf16 %v48_v4, %v47_v2  ;;  %v44_v7 = vld [vmem:[#allocation2 + $0x8] sm:$0xff]  ;;  %s235_s13 = scalar_lea.vmem %s146_s12, 256  ;;  %p240_p3 = scmp.lt.s32.totalorder %s146_s12, %s146_s12 }
  0x29   :  { %175 = vmatprep.mubr.msk.f32.mxu0 %vm56_vm0, %v43_v5  ;;  %179 = vmatprep.subr.bf16.mxu0 %v178_v3  ;;  %v158_v8 = vld [vmem:[%s338_s2] ss:$0 sm:$0xff]  ;;  %p236_p2 = scmp.ne.s32.totalorder %s146_s12, %s235_s13  ;;  %p241_p4 = scmp.lt.s32.totalorder %s235_s13, %s235_s13 }
  0x2a   :  { %181 = vmatpush3.bf16.msra.mxu0 %v178_v3 }
  0x2b   :  { %183 = vmatprep.subr.bf16.mxu0 %v182_v6  ;;  %p242_p5 = por %p241_p4, %p240_p3 }
  0x2d   :  { %p243_p6 = pnand %p242_p5, %p236_p2 }
  0x2e   :  { %185 = vmatpush3.bf16.msra.mxu0 %v182_v6 }
  0x31   :  { %176 = vmatmul.mubr.msk.f32.vlgmr.msra.gmra.mrb[0].mxu0 %vm56_vm0, %v44_v7 }
 0x104   :  { %v177_v9 = vpop.f32.mrb[0].mxu0 }
 0x105   :  { %v135_v10 = vadd.f32 %v177_v9, %v158_v8  ;;  %v129_v11 = vpop.f32.mrb[1].mxu0 }
 0x106   :  { %v130_v12 = vadd.f32 %v158_v8, %v129_v11 }
 0x107   :  { %139 = vst [vmem:[#allocation7 + $0x8] sm:$0xff] %v135_v10 }
 0x108   :  { %138 = vst [vmem:[#allocation7] sm:$0xff] %v130_v12 }
 0x109   :  { %246 = shalt.err (!%p243_p6)
}
 0x10a   :  { %s247_s2 = scalar_lea.hbm %s339_s3, 256 }
 0x10b   :  { %p248_p7 = scmp.ne.s32.totalorder %s339_s3, %s247_s2  ;;  %p251_p8 = scmp.lt.u32.totalorder %s247_s2, %s339_s3 }
 0x10d   :  { %p253_p9 = pnand %p251_p8, %p248_p7 }
 0x10f   :  { %256 = shalt.err (!%p253_p9)
}
 0x110   :  { %151 = dma.vmem_to_hbm [thread:$0]  %s146_s12, 256, %s339_s3, [#allocation4], %s264_s22, %s264_s22, %s265_s23  }
 0x111   :  { %261 = dma.done.wait [#allocation4], 256  }
 0x112   :  { %262 = vsyncadd [#allocation4], 4294967040 }
 0x113   :  { %155 = vsyncpa [#allocation3], 1 }
 0x114   :  { %156 = vsyncpa [#allocation6], 1 }
 0x115   :  { %157 = vsyncpa [#allocation4], 1 }

// kernel: tpu_custom_call.1
= control target key start
LH: loop header
LB: loop body
LE: loop exit
PB: predicated region body
PF: predicated region fallthrough
CT: control target
= control target key end

     0   :  { %8 = vsyncpa [#allocation3], 0  ;;  %s336_s0 = inlined_call_operand.hbm [shape: f32[16,32], index: 0, kind: input, shape index: {}]   ;;  %s337_s1 = inlined_call_operand.hbm [shape: f32[32,128], index: 1, kind: input, shape index: {}]   ;;  %s338_s2 = inlined_call_operand.vmem [shape: f32[1,128], index: 2, kind: input, shape index: {}]   ;;  %s339_s3 = inlined_call_operand.hbm [shape: f32[16,128], index: 3, kind: output, shape index: {}]  }
   0x1   :  { %9 = vsyncpa [#allocation6], 0 }
   0x2   :  { %10 = vsyncpa [#allocation4], 0  ;;  %s263_s12 = smov [#allocation2]   ;;  %s191_s16 = scalar_lea.hbm %s336_s0, 256 }
   0x3   :  { %s16_s13 = sshll.u32 %s263_s12, 4  ;;  %p192_p0 = scmp.ne.s32.totalorder %s336_s0, %s191_s16  ;;  %s17_s13 = int_to_ptr.vmem [resolvable:$true] %s16_s13 }
   0x4   :  { %p195_p1 = scmp.lt.u32.totalorder %s191_s16, %s336_s0 }
   0x6   :  { %p197_p2 = pnand %p195_p1, %p192_p0 }
   0x8   :  { %200 = shalt.err (!%p197_p2)
}
   0x9   :  { %s201_s21 = scalar_lea.vmem %s17_s13, 256  ;;  %p206_p4 = scmp.lt.s32.totalorder %s17_s13, %s17_s13 }
   0xa   :  { %p202_p3 = scmp.ne.s32.totalorder %s17_s13, %s201_s21  ;;  %p207_p5 = scmp.lt.s32.totalorder %s201_s21, %s201_s21 }
   0xc   :  { %p208_p6 = por %p207_p5, %p206_p4 }
   0xe   :  { %p209_p7 = pnand %p208_p6, %p202_p3 }
  0x10   :  { %212 = shalt.err (!%p209_p7)
}
  0x11   :  { %s264_s22 = smov 128   ;;  %s265_s23 = smov 8  }
  0x12   :  { %22 = dma.hbm_to_vmem [thread:$0]  %s336_s0, 256, %s17_s13, [#allocation3], %s264_s22, %s264_s22, %s265_s23  }
  0x13   :  { %s266_s26 = smov [#allocation5]   ;;  %s213_s30 = scalar_lea.hbm %s337_s1, 512 }
  0x14   :  { %s28_s27 = sshll.u32 %s266_s26, 4  ;;  %p214_p8 = scmp.ne.s32.totalorder %s337_s1, %s213_s30  ;;  %s29_s27 = int_to_ptr.vmem [resolvable:$true] %s28_s27 }
  0x15   :  { %p217_p9 = scmp.lt.u32.totalorder %s213_s30, %s337_s1 }
  0x17   :  { %p219_p10 = pnand %p217_p9, %p214_p8 }
  0x19   :  { %222 = shalt.err (!%p219_p10)
}
  0x1a   :  { %s223_s8 = scalar_lea.vmem %s29_s27, 512  ;;  %p228_p12 = scmp.lt.s32.totalorder %s29_s27, %s29_s27 }
  0x1b   :  { %p224_p11 = scmp.ne.s32.totalorder %s29_s27, %s223_s8  ;;  %p229_p13 = scmp.lt.s32.totalorder %s223_s8, %s223_s8 }
  0x1d   :  { %p230_p0 = por %p229_p13, %p228_p12 }
  0x1f   :  { %p231_p1 = pnand %p230_p0, %p224_p11 }
  0x21   :  { %234 = shalt.err (!%p231_p1)
}
  0x22   :  { %34 = dma.hbm_to_vmem [thread:$0]  %s337_s1, 512, %s29_s27, [#allocation6], %s264_s22, %s264_s22, %s265_s23  }
  0x23   :  { %257 = dma.done.wait [#allocation3], 256  }
  0x24   :  { %258 = vsyncadd [#allocation3], 4294967040 }
  0x25   :  { %259 = dma.done.wait [#allocation6], 512  }
  0x26   :  { %260 = vsyncadd [#allocation6], 4294966784  ;;  %vm56_vm0 = vcmask 261120   ;;  %v45_v0 = vld [vmem:[#allocation5] sm:$0xff]  ;;  %v46_v1 = vld [vmem:[#allocation5 + $0x8] sm:$0xff]  ;;  %s267_s11 = smov [#allocation7]  }
  0x27   :  { %v47_v2 = vld [vmem:[#allocation5 + $0x10] sm:$0xff]  ;;  %v178_v3 = vpack.c.bf16 %v46_v1, %v45_v0  ;;  %v48_v4 = vld [vmem:[#allocation5 + $0x18] sm:$0xff]  ;;  %s145_s12 = sshll.u32 %s267_s11, 4  ;;  %s146_s12 = int_to_ptr.vmem [resolvable:$true] %s145_s12 }
  0x28   :  { %v43_v5 = vld [vmem:[#allocation2] sm:$0xff]  ;;  %v182_v6 = vpack.c.bf16 %v48_v4, %v47_v2  ;;  %v44_v7 = vld [vmem:[#allocation2 + $0x8] sm:$0xff]  ;;  %s235_s13 = scalar_lea.vmem %s146_s12, 256  ;;  %p240_p3 = scmp.lt.s32.totalorder %s146_s12, %s146_s12 }
  0x29   :  { %175 = vmatprep.mubr.msk.f32.mxu0 %vm56_vm0, %v43_v5  ;;  %179 = vmatprep.subr.bf16.mxu0 %v178_v3  ;;  %v158_v8 = vld [vmem:[%s338_s2] ss:$0 sm:$0xff]  ;;  %p236_p2 = scmp.ne.s32.totalorder %s146_s12, %s235_s13  ;;  %p241_p4 = scmp.lt.s32.totalorder %s235_s13, %s235_s13 }
  0x2a   :  { %181 = vmatpush3.bf16.msra.mxu0 %v178_v3 }
  0x2b   :  { %183 = vmatprep.subr.bf16.mxu0 %v182_v6  ;;  %p242_p5 = por %p241_p4, %p240_p3 }
  0x2d   :  { %p243_p6 = pnand %p242_p5, %p236_p2 }
  0x2e   :  { %185 = vmatpush3.bf16.msra.mxu0 %v182_v6 }
  0x31   :  { %176 = vmatmul.mubr.msk.f32.vlgmr.msra.gmra.mrb[0].mxu0 %vm56_vm0, %v44_v7 }
 0x104   :  { %v177_v9 = vpop.f32.mrb[0].mxu0 }
 0x105   :  { %v135_v10 = vadd.f32 %v177_v9, %v158_v8  ;;  %v129_v11 = vpop.f32.mrb[1].mxu0 }
 0x106   :  { %v130_v12 = vadd.f32 %v158_v8, %v129_v11 }
 0x107   :  { %139 = vst [vmem:[#allocation7 + $0x8] sm:$0xff] %v135_v10 }
 0x108   :  { %138 = vst [vmem:[#allocation7] sm:$0xff] %v130_v12 }
 0x109   :  { %246 = shalt.err (!%p243_p6)
}
 0x10a   :  { %s247_s2 = scalar_lea.hbm %s339_s3, 256 }
 0x10b   :  { %p248_p7 = scmp.ne.s32.totalorder %s339_s3, %s247_s2  ;;  %p251_p8 = scmp.lt.u32.totalorder %s247_s2, %s339_s3 }
 0x10d   :  { %p253_p9 = pnand %p251_p8, %p248_p7 }
 0x10f   :  { %256 = shalt.err (!%p253_p9)
}
 0x110   :  { %151 = dma.vmem_to_hbm [thread:$0]  %s146_s12, 256, %s339_s3, [#allocation4], %s264_s22, %s264_s22, %s265_s23  }
 0x111   :  { %261 = dma.done.wait [#allocation4], 256  }
 0x112   :  { %262 = vsyncadd [#allocation4], 4294967040 }
 0x113   :  { %155 = vsyncpa [#allocation3], 1 }
 0x114   :  { %156 = vsyncpa [#allocation6], 1 }
 0x115   :  { %157 = vsyncpa [#allocation4], 1 }

</bundles_post_ra>
